<compile_context>
chip_gen: v6e
topology: v6e:2x2x1
jax: 0.10.0
libtpu: 0.0.40
codegen_flags: <defaults>
</compile_context>

<pallas_src>
import functools
import math

import jax
import jax.numpy as jnp
from jax.experimental import pallas as pl
from jax.experimental.pallas import tpu as pltpu


# ------------------------------ helpers ------------------------------

def _round_up(v, m):
    return ((v + m - 1) // m) * m


def _vmem_limit_bytes():
    """Generation-aware scoped-VMEM budget (64 MiB on v7x, 128 MiB on v5e/v6e)."""
    try:
        cap = int(pltpu.get_tpu_info().vmem_capacity_bytes)
    except Exception:
        cap = 64 * 1024 * 1024
    return min(cap - 16 * 1024 * 1024, 100 * 1024 * 1024)


def make_up_matrix(L_in, k=16, s=8, p=4):
    """1D factor of fill_up_weights' bilinear ConvTranspose kernel as a matrix.

    ConvTranspose1d semantics: y[o] = sum_i x[i] * w1d[o + p - s*i]  (k taps).
    Returns U of shape (L_out, L_in) with L_out = 8 * L_in, so y = U @ x.
    """
    f = math.ceil(k / 2)                      # 8
    c = (2 * f - 1 - f % 2) / (2.0 * f)       # 0.9375
    w1d = jnp.array([1.0 - abs(i / f - c) for i in range(k)], jnp.float32)
    L_out = (L_in - 1) * s - 2 * p + k        # = 8 * L_in
    o = jnp.arange(L_out)[:, None]
    i = jnp.arange(L_in)[None, :]
    kk = o + p - s * i
    mask = (kk >= 0) & (kk < k)
    return jnp.where(mask, w1d[jnp.clip(kk, 0, k - 1)], 0.0)    # (L_out, L_in)


# ------------------------------ kernels ------------------------------

def _fused_conv_seg_kernel(x_ref, wb_ref, bb_ref, ws_ref, bs_ref, o_ref):
    """One-pass fusion: feat = relu(X_tile @ Wb + bb); out = feat @ Ws + bs.

    Full (K, Dp) base weight and (Dp, Cp) seg weight are VMEM-resident (constant
    index_maps); feat never leaves VMEM; only the lane-padded seg tile is stored.
    """
    feat = jnp.dot(x_ref[...], wb_ref[...], preferred_element_type=jnp.float32)
    feat = jnp.maximum(feat + bb_ref[...], 0.0)
    o_ref[...] = (jnp.dot(feat.astype(ws_ref.dtype), ws_ref[...],
                          preferred_element_type=jnp.float32) + bs_ref[...])


def _fused_conv_seg_kernel_acc(x_ref, wb_ref, bb_ref, ws_ref, bs_ref, o_ref,
                               acc_ref):
    """Fallback for large K: accumulate over a K grid axis, epilogue on last step."""
    k = pl.program_id(1)

    @pl.when(k == 0)
    def _():
        acc_ref[...] = jnp.zeros_like(acc_ref)

    acc_ref[...] += jnp.dot(x_ref[...], wb_ref[...],
                            preferred_element_type=jnp.float32)

    @pl.when(k == pl.num_programs(1) - 1)
    def _():
        feat = jnp.maximum(acc_ref[...] + bb_ref[...], 0.0)
        o_ref[...] = (jnp.dot(feat.astype(ws_ref.dtype), ws_ref[...],
                              preferred_element_type=jnp.float32) + bs_ref[...])


def _bilinear_up_kernel(x_ref, uh_ref, uwt_ref, o_ref):
    """Batched separable bilinear x8 upsample for a block of (n, class) maps.

    x_ref: (bb, Hf, Wf) f32; uh_ref: (Ho, Hf) bf16; uwt_ref: (Wf, Wo) bf16;
    o_ref: (bb, Ho, Wo) f32.  All matmuls are bf16 operands, f32 accumulation.
    """
    bb = x_ref.shape[0]
    xb = x_ref[...].astype(jnp.bfloat16)
    # W pass: lane-dense contraction over Wf -> (bb, Hf, Wo), non-batched.
    t = jax.lax.dot_general(
        xb, uwt_ref[...],
        dimension_numbers=(((2,), (0,)), ((), ())),
        preferred_element_type=jnp.float32).astype(jnp.bfloat16)
    # H pass: batched matmul over the map dim; the uh broadcast is bf16 only.
    uh_b = jnp.broadcast_to(uh_ref[...][None, :, :], (bb,) + uh_ref.shape)
    o_ref[...] = jax.lax.dot_general(
        uh_b, t,
        dimension_numbers=(((2,), (1,)), ((0,), (0,))),
        preferred_element_type=jnp.float32)


# --------------------------- pallas wrappers ---------------------------

def fused_conv_seg(x_bf16, w_base, b_base, w_seg, b_seg):
    """relu(x @ w_base + b_base) @ w_seg + b_seg, tiled over rows (M).

    x_bf16: (M, K) bf16;  w_base: (K, D);  w_seg: (D, classes).
    Returns (M, classes) f32.
    """
    M, K = x_bf16.shape
    D = w_base.shape[1]
    C = w_seg.shape[1]
    vmem = _vmem_limit_bytes()

    # 256-rounding feeds the 256-wide MXU on v6e/v7x; 128 when D is tiny.
    Dp = _round_up(D, 256) if D > 128 else 128
    Cp = _round_up(C, 128)          # lane-dense seg output (unmasked stores)

    tm_target = 1024 if vmem > 64 * 1024 * 1024 else 512
    tm = min(tm_target, _round_up(M, 8))
    if M > 8 and _round_up(M, tm) // tm < 2:
        tm = _round_up((M + 1) // 2, 8)      # >= 2 M tiles (v7x megacore)
    Mp = _round_up(M, tm)

    xp = x_bf16 if Mp == M else jnp.pad(x_bf16, ((0, Mp - M), (0, 0)))
    wbp = jnp.zeros((K, Dp), jnp.bfloat16).at[:, :D].set(w_base.astype(jnp.bfloat16))
    bbp = jnp.zeros((1, Dp), jnp.float32).at[:, :D].set(b_base.astype(jnp.float32)[None, :])
    wsp = jnp.zeros((Dp, Cp), jnp.bfloat16).at[:D, :C].set(w_seg.astype(jnp.bfloat16))
    bsp = jnp.zeros((1, Cp), jnp.float32).at[:, :C].set(b_seg.astype(jnp.float32)[None, :])

    one_pass = K * Dp * 2 <= 8 * 1024 * 1024     # full bf16 weight fits in VMEM

    if one_pass:
        out = pl.pallas_call(
            _fused_conv_seg_kernel,
            out_shape=jax.ShapeDtypeStruct((Mp, Cp), jnp.float32),
            grid=(Mp // tm,),
            in_specs=[
                pl.BlockSpec((tm, K), lambda i: (i, 0)),
                pl.BlockSpec((K, Dp), lambda i: (0, 0)),      # weight resident
                pl.BlockSpec((1, Dp), lambda i: (0, 0)),
                pl.BlockSpec((Dp, Cp), lambda i: (0, 0)),
                pl.BlockSpec((1, Cp), lambda i: (0, 0)),
            ],
            out_specs=pl.BlockSpec((tm, Cp), lambda i: (i, 0)),
            compiler_params=pltpu.CompilerParams(
                dimension_semantics=("parallel",),
                vmem_limit_bytes=vmem),
        )(xp, wbp, bbp, wsp, bsp)
    else:
        # Large-K fallback (not used by the stand-in base conv): K reduction axis.
        tk = 512
        Kp = _round_up(K, tk)
        xp2 = jnp.pad(xp, ((0, 0), (0, Kp - K))) if Kp != K else xp
        wbp2 = jnp.pad(wbp, ((0, Kp - K), (0, 0))) if Kp != K else wbp
        out = pl.pallas_call(
            _fused_conv_seg_kernel_acc,
            out_shape=jax.ShapeDtypeStruct((Mp, Cp), jnp.float32),
            grid=(Mp // tm, Kp // tk),
            in_specs=[
                pl.BlockSpec((tm, tk), lambda i, k: (i, k)),
                pl.BlockSpec((tk, Dp), lambda i, k: (k, 0)),
                pl.BlockSpec((1, Dp), lambda i, k: (0, 0)),
                pl.BlockSpec((Dp, Cp), lambda i, k: (0, 0)),
                pl.BlockSpec((1, Cp), lambda i, k: (0, 0)),
            ],
            out_specs=pl.BlockSpec((tm, Cp), lambda i, k: (i, 0)),
            scratch_shapes=[pltpu.VMEM((tm, Dp), jnp.float32)],
            compiler_params=pltpu.CompilerParams(
                dimension_semantics=("parallel", "arbitrary"),
                vmem_limit_bytes=vmem),
        )(xp2, wbp2, bbp, wsp, bsp)
    return out[:M, :C]


def bilinear_upsample8(seg_nchw, uh, uwt):
    """Fixed-bilinear x8 upsample (ConvTranspose2d k=16, s=8, p=4, depthwise)."""
    N, C, Hf, Wf = seg_nchw.shape
    B = N * C
    Ho, Wo = uh.shape[0], uwt.shape[1]
    vmem = _vmem_limit_bytes()

    # Lane-dense output stores: pad Wo to a 128 multiple when overhead <= 25%
    # (true for real image widths); keep exact width for tiny test shapes.
    Wo_p = _round_up(Wo, 128)
    if Wo_p > Wo and Wo_p * 4 > Wo * 5:
        Wo_p = Wo
    uwt_p = uwt if Wo_p == Wo else jnp.pad(uwt, ((0, 0), (0, Wo_p - Wo)))

    x = seg_nchw.reshape(B, Hf, Wf)
    uh_b16 = uh.astype(jnp.bfloat16)
    uwt_b16 = uwt_p.astype(jnp.bfloat16)

    # Per-map VMEM footprint: double-buffered in/out blocks, f32+bf16 intermediate
    # t, and the bf16 uh broadcast.  Size bb against the real budget.
    per_map = (2 * Ho * Wo_p * 4 + 2 * Hf * Wf * 4
               + Hf * Wo_p * (4 + 2) + Ho * Hf * 2)
    fixed = (Ho * Hf + Wf * Wo_p) * 2
    bb_cap = max(1, int(vmem * 0.6 - fixed) // per_map)
    if B >= 2:
        bb_cap = min(bb_cap, B // 2)      # >= 2 grid steps for v7x's 2 TensorCores
    bb_cap = max(1, min(bb_cap, B))

    bb = max(d for d in range(1, bb_cap + 1) if B % d == 0)
    if bb * 4 < bb_cap * 3:               # no decent divisor: pad B instead of shrinking bb
        bb = bb_cap
    B_p = _round_up(B, bb)
    if B_p != B:
        x = jnp.pad(x, ((0, B_p - B), (0, 0), (0, 0)))

    out = pl.pallas_call(
        _bilinear_up_kernel,
        out_shape=jax.ShapeDtypeStruct((B_p, Ho, Wo_p), jnp.float32),
        grid=(B_p // bb,),
        in_specs=[
            pl.BlockSpec((bb, Hf, Wf), lambda i: (i, 0, 0)),
            pl.BlockSpec((Ho, Hf), lambda i: (0, 0)),
            pl.BlockSpec((Wf, Wo_p), lambda i: (0, 0)),
        ],
        out_specs=pl.BlockSpec((bb, Ho, Wo_p), lambda i: (i, 0, 0)),
        compiler_params=pltpu.CompilerParams(
            dimension_semantics=("parallel",),
            vmem_limit_bytes=vmem),
    )(x, uh_b16, uwt_b16)

    if B_p != B or Wo_p != Wo:
        out = out[:B, :, :Wo]
    return out.reshape(N, C, Ho, Wo)


# --------------------------- parameters (glue) ---------------------------

def init_params(key, in_ch, out_dim, classes):
    k1, k2 = jax.random.split(key)
    # synthetic stand-in base conv (in_ch -> out_dim, kernel 8, stride 8)
    base_w = jax.random.normal(k1, (in_ch * 8 * 8, out_dim), jnp.float32) * 0.05
    base_b = jnp.zeros((out_dim,), jnp.float32)
    # seg = nn.Conv2d(out_dim, classes, 1): weight ~ N(0, sqrt(2/n)), n = 1*1*classes
    n = 1 * 1 * classes
    seg_w = jax.random.normal(k2, (out_dim, classes), jnp.float32) * math.sqrt(2.0 / n)
    seg_b = jnp.zeros((classes,), jnp.float32)
    return dict(base_w=base_w, base_b=base_b, seg_w=seg_w, seg_b=seg_b)


# ------------------------------ forward ------------------------------

def drnseg_forward(x, params, *, classes, return_features=False):
    N, C, H, W = x.shape
    Hf, Wf = H // 8, W // 8
    M = N * Hf * Wf

    # TODO(synk): self.base is the full external DRN backbone (the `drn` module is
    # not provided); approximated here by a single stride-8 8x8 conv + ReLU that
    # matches DRN's shape contract (output stride 8, out_dim channels).
    # Single-pass bf16 im2col: cast once, patchify; no separate (M,K) f32
    # intermediate followed by a bf16 pad pass.
    # TODO(synk): could be folded fully into the kernel via an NHWC patch index_map.
    patches = (x.astype(jnp.bfloat16)
                 .reshape(N, C, Hf, 8, Wf, 8)
                 .transpose(0, 2, 4, 1, 3, 5)
                 .reshape(M, C * 64))

    # Fused: base conv (matmul + bias + ReLU) -> seg 1x1 conv, single kernel.
    seg_flat = fused_conv_seg(patches, params['base_w'], params['base_b'],
                              params['seg_w'], params['seg_b'])     # (M, classes)
    seg_nchw = seg_flat.reshape(N, Hf, Wf, classes).transpose(0, 3, 1, 2)

    # self.up: fixed-bilinear depthwise ConvTranspose2d as separable matmuls
    # (uw pre-transposed in the wrapper; never transposed inside the kernel).
    uh = make_up_matrix(Hf)            # (Ho, Hf)
    uwt = make_up_matrix(Wf).T         # (Wf, Wo)
    y = bilinear_upsample8(seg_nchw, uh, uwt)                        # (N, cls, H, W)

    if return_features:
        return y, seg_nchw
    return y


if __name__ == "__main__":
    key = jax.random.PRNGKey(0)
    kx, kp = jax.random.split(key)

    N, C, H, W = 2, 3, 32, 32      # small image input (NCHW, like PyTorch)
    out_dim, classes = 16, 4       # small stand-ins for DRN out_dim / num classes

    x = jax.random.normal(kx, (N, C, H, W), jnp.float32)
    params = init_params(kp, in_ch=C, out_dim=out_dim, classes=classes)

    fwd = jax.jit(functools.partial(drnseg_forward, classes=classes))
    y = fwd(x, params)
    jax.block_until_ready(y)

    assert y.shape == (N, classes, H, W), y.shape
    assert y.dtype == jnp.float32
    print("KERNEL_OK")
</pallas_src>

<mosaic_0001>
module attributes {stable_mosaic.version = 11 : i64} {
  func.func @_fused_conv_seg_kernel(%arg0: i32, %arg1: memref<16x192xbf16, #tpu.memory_space<vmem>>, %arg2: memref<192x128xbf16, #tpu.memory_space<vmem>>, %arg3: memref<1x128xf32, #tpu.memory_space<vmem>>, %arg4: memref<128x128xbf16, #tpu.memory_space<vmem>>, %arg5: memref<1x128xf32, #tpu.memory_space<vmem>>, %arg6: memref<16x128xf32, #tpu.memory_space<vmem>>) attributes {dimension_semantics = [#tpu.dimension_semantics<parallel>], iteration_bounds = array<i64: 2>, scalar_prefetch = 0 : i64, scratch_operands = 0 : i64, tpu.core_type = #tpu.core_type<tc>, window_params = [{transform_indices = @transform_0, window_bounds = array<i64: 16, 192>}, {pipeline_mode = #tpu.pipeline_mode<synchronous>, transform_indices = @transform_1, window_bounds = array<i64: 192, 128>}, {pipeline_mode = #tpu.pipeline_mode<synchronous>, transform_indices = @transform_2, window_bounds = array<i64: 1, 128>}, {pipeline_mode = #tpu.pipeline_mode<synchronous>, transform_indices = @transform_3, window_bounds = array<i64: 128, 128>}, {pipeline_mode = #tpu.pipeline_mode<synchronous>, transform_indices = @transform_4, window_bounds = array<i64: 1, 128>}, {transform_indices = @transform_5, window_bounds = array<i64: 16, 128>}]} {
    %c0 = arith.constant 0 : index
    %c0_0 = arith.constant 0 : index
    %0 = vector.load %arg1[%c0, %c0_0] : memref<16x192xbf16, #tpu.memory_space<vmem>>, vector<16x192xbf16>
    %c0_1 = arith.constant 0 : index
    %c0_2 = arith.constant 0 : index
    %1 = vector.load %arg2[%c0_1, %c0_2] : memref<192x128xbf16, #tpu.memory_space<vmem>>, vector<192x128xbf16>
    %cst = arith.constant dense<0.000000e+00> : vector<16x128xf32>
    %2 = tpu.matmul %0, %1, %cst {dimension_numbers = #tpu.dot_dimension_numbers<[1], [0], [0], [1], [0, 0, 1, 1], [], []>} : vector<16x192xbf16>, vector<192x128xbf16>, vector<16x128xf32> -> vector<16x128xf32>
    %c0_3 = arith.constant 0 : index
    %c0_4 = arith.constant 0 : index
    %3 = vector.load %arg3[%c0_3, %c0_4] : memref<1x128xf32, #tpu.memory_space<vmem>>, vector<1x128xf32>
    %4 = vector.broadcast %3 : vector<1x128xf32> to vector<16x128xf32>
    %5 = arith.addf %2, %4 : vector<16x128xf32>
    %cst_5 = arith.constant 0.000000e+00 : f32
    %6 = vector.broadcast %cst_5 : f32 to vector<16x128xf32>
    %7 = arith.maximumf %5, %6 : vector<16x128xf32>
    %8 = arith.truncf %7 : vector<16x128xf32> to vector<16x128xbf16>
    %c0_6 = arith.constant 0 : index
    %c0_7 = arith.constant 0 : index
    %9 = vector.load %arg4[%c0_6, %c0_7] : memref<128x128xbf16, #tpu.memory_space<vmem>>, vector<128x128xbf16>
    %cst_8 = arith.constant dense<0.000000e+00> : vector<16x128xf32>
    %10 = tpu.matmul %8, %9, %cst_8 {dimension_numbers = #tpu.dot_dimension_numbers<[1], [0], [0], [1], [0, 0, 1, 1], [], []>} : vector<16x128xbf16>, vector<128x128xbf16>, vector<16x128xf32> -> vector<16x128xf32>
    %c0_9 = arith.constant 0 : index
    %c0_10 = arith.constant 0 : index
    %11 = vector.load %arg5[%c0_9, %c0_10] : memref<1x128xf32, #tpu.memory_space<vmem>>, vector<1x128xf32>
    %12 = vector.broadcast %11 : vector<1x128xf32> to vector<16x128xf32>
    %13 = arith.addf %10, %12 : vector<16x128xf32>
    %c0_11 = arith.constant 0 : index
    %c0_12 = arith.constant 0 : index
    %14 = vector.load %arg6[%c0_11, %c0_12] : memref<16x128xf32, #tpu.memory_space<vmem>>, vector<16x128xf32>
    tpu.vector_store %arg6[%c0_11, %c0_12], %13 {strides = array<i32>} : memref<16x128xf32, #tpu.memory_space<vmem>>, vector<16x128xf32>,
    return
  }
  func.func @transform_0(%arg0: i32) -> (i32, i32) {
    %c0_i32 = arith.constant 0 : i32
    %c0_i32_0 = arith.constant 0 : i32
    return %arg0, %c0_i32 : i32, i32
  }
  func.func @transform_1(%arg0: i32) -> (i32, i32) {
    %c0_i32 = arith.constant 0 : i32
    %c0_i32_0 = arith.constant 0 : i32
    %c0_i32_1 = arith.constant 0 : i32
    return %c0_i32, %c0_i32_0 : i32, i32
  }
  func.func @transform_2(%arg0: i32) -> (i32, i32) {
    %c0_i32 = arith.constant 0 : i32
    %c0_i32_0 = arith.constant 0 : i32
    %c0_i32_1 = arith.constant 0 : i32
    return %c0_i32, %c0_i32_0 : i32, i32
  }
  func.func @transform_3(%arg0: i32) -> (i32, i32) {
    %c0_i32 = arith.constant 0 : i32
    %c0_i32_0 = arith.constant 0 : i32
    %c0_i32_1 = arith.constant 0 : i32
    return %c0_i32, %c0_i32_0 : i32, i32
  }
  func.func @transform_4(%arg0: i32) -> (i32, i32) {
    %c0_i32 = arith.constant 0 : i32
    %c0_i32_0 = arith.constant 0 : i32
    %c0_i32_1 = arith.constant 0 : i32
    return %c0_i32, %c0_i32_0 : i32, i32
  }
  func.func @transform_5(%arg0: i32) -> (i32, i32) {
    %c0_i32 = arith.constant 0 : i32
    %c0_i32_0 = arith.constant 0 : i32
    return %arg0, %c0_i32 : i32, i32
  }
}

module attributes {stable_mosaic.version = 11 : i64} {
  func.func @_bilinear_up_kernel(%arg0: i32, %arg1: memref<4x4x4xf32, #tpu.memory_space<vmem>>, %arg2: memref<32x4xbf16, #tpu.memory_space<vmem>>, %arg3: memref<4x32xbf16, #tpu.memory_space<vmem>>, %arg4: memref<4x32x32xf32, #tpu.memory_space<vmem>>) attributes {dimension_semantics = [#tpu.dimension_semantics<parallel>], iteration_bounds = array<i64: 2>, scalar_prefetch = 0 : i64, scratch_operands = 0 : i64, tpu.core_type = #tpu.core_type<tc>, window_params = [{transform_indices = @transform_0, window_bounds = array<i64: 4, 4, 4>}, {pipeline_mode = #tpu.pipeline_mode<synchronous>, transform_indices = @transform_1, window_bounds = array<i64: 32, 4>}, {pipeline_mode = #tpu.pipeline_mode<synchronous>, transform_indices = @transform_2, window_bounds = array<i64: 4, 32>}, {transform_indices = @transform_3, window_bounds = array<i64: 4, 32, 32>}]} {
    %c0 = arith.constant 0 : index
    %c0_0 = arith.constant 0 : index
    %c0_1 = arith.constant 0 : index
    %0 = vector.load %arg1[%c0, %c0_0, %c0_1] : memref<4x4x4xf32, #tpu.memory_space<vmem>>, vector<4x4x4xf32>
    %1 = arith.truncf %0 : vector<4x4x4xf32> to vector<4x4x4xbf16>
    %c0_2 = arith.constant 0 : index
    %c0_3 = arith.constant 0 : index
    %2 = vector.load %arg3[%c0_2, %c0_3] : memref<4x32xbf16, #tpu.memory_space<vmem>>, vector<4x32xbf16>
    %cst = arith.constant dense<0.000000e+00> : vector<4x4x32xf32>
    %3 = tpu.matmul %1, %2, %cst {dimension_numbers = #tpu.dot_dimension_numbers<[2], [0], [0, 1], [1], [0, 0, 0, 1, 1, 1], [], []>} : vector<4x4x4xbf16>, vector<4x32xbf16>, vector<4x4x32xf32> -> vector<4x4x32xf32>
    %4 = arith.truncf %3 : vector<4x4x32xf32> to vector<4x4x32xbf16>
    %c0_4 = arith.constant 0 : index
    %c0_5 = arith.constant 0 : index
    %5 = vector.load %arg2[%c0_4, %c0_5] : memref<32x4xbf16, #tpu.memory_space<vmem>>, vector<32x4xbf16>
    %6 = vector.shape_cast %5 : vector<32x4xbf16> to vector<1x32x4xbf16>
    %7 = vector.shape_cast %6 : vector<1x32x4xbf16> to vector<1x32x4xbf16>
    %8 = vector.broadcast %7 : vector<1x32x4xbf16> to vector<4x32x4xbf16>
    %cst_6 = arith.constant dense<0.000000e+00> : vector<4x32x32xf32>
    %9 = tpu.matmul %8, %4, %cst_6 {dimension_numbers = #tpu.dot_dimension_numbers<[2], [1], [1], [2], [0, 0, 0, 1, 1, 2], [0], [0]>} : vector<4x32x4xbf16>, vector<4x4x32xbf16>, vector<4x32x32xf32> -> vector<4x32x32xf32>
    %c0_7 = arith.constant 0 : index
    %c0_8 = arith.constant 0 : index
    %c0_9 = arith.constant 0 : index
    %10 = vector.load %arg4[%c0_7, %c0_8, %c0_9] : memref<4x32x32xf32, #tpu.memory_space<vmem>>, vector<4x32x32xf32>
    tpu.vector_store %arg4[%c0_7, %c0_8, %c0_9], %9 {strides = array<i32>} : memref<4x32x32xf32, #tpu.memory_space<vmem>>, vector<4x32x32xf32>,
    return
  }
  func.func @transform_0(%arg0: i32) -> (i32, i32, i32) {
    %c0_i32 = arith.constant 0 : i32
    %c0_i32_0 = arith.constant 0 : i32
    %c0_i32_1 = arith.constant 0 : i32
    return %arg0, %c0_i32, %c0_i32_0 : i32, i32, i32
  }
  func.func @transform_1(%arg0: i32) -> (i32, i32) {
    %c0_i32 = arith.constant 0 : i32
    %c0_i32_0 = arith.constant 0 : i32
    %c0_i32_1 = arith.constant 0 : i32
    return %c0_i32, %c0_i32_0 : i32, i32
  }
  func.func @transform_2(%arg0: i32) -> (i32, i32) {
    %c0_i32 = arith.constant 0 : i32
    %c0_i32_0 = arith.constant 0 : i32
    %c0_i32_1 = arith.constant 0 : i32
    return %c0_i32, %c0_i32_0 : i32, i32
  }
  func.func @transform_3(%arg0: i32) -> (i32, i32, i32) {
    %c0_i32 = arith.constant 0 : i32
    %c0_i32_0 = arith.constant 0 : i32
    %c0_i32_1 = arith.constant 0 : i32
    return %arg0, %c0_i32, %c0_i32_0 : i32, i32, i32
  }
}

</mosaic_0001>

<bundles_post_ra>
// kernel: drnseg_forward.2
= control target key start
LH: loop header
LB: loop body
LE: loop exit
PB: predicated region body
PF: predicated region fallthrough
CT: control target
= control target key end

     0   :  { %s706_s18 = smov 0   ;;  %s800_s0 = inlined_call_operand.vmem [shape: bf16[32,192], index: 0, kind: input, shape index: {}]   ;;  %s801_s1 = inlined_call_operand.vmem [shape: bf16[192,128], index: 1, kind: input, shape index: {}]   ;;  %s802_s2 = inlined_call_operand.vmem [shape: f32[1,128], index: 2, kind: input, shape index: {}]   ;;  %s803_s3 = inlined_call_operand.vmem [shape: bf16[128,128], index: 3, kind: input, shape index: {}]   ;;  %s804_s4 = inlined_call_operand.vmem [shape: f32[1,128], index: 4, kind: input, shape index: {}]   ;;  %s805_s5 = inlined_call_operand.vmem [shape: f32[32,128], index: 5, kind: output, shape index: {}]  }
   0x1 LB: > { %s564_s19 = sadd.s32 4294967295, %s671_s18   ;;  %p568_p0 = scmp.ge.s32.totalorder %s671_s18, 1  ;;  %s671_s18 = sphi %s706_s18, %s15_s18  }
   0x2   : > { %p189_p1 = scmp.lt.s32.totalorder %s671_s18, 3 }
   0x4   : > { %p190_p2 = pnand %p568_p0, %p189_p1 }
   0x5   : > { %s569_s22 = sshll.u32 (!%p190_p2), %s564_s19, 1 }
   0x6   : > { %193 = sbr.rel (%p190_p2) target bundleno = 463 (0x1cf), region = 40  ;;  %p219_p3 = scmp.lt.s32.totalorder (!%p190_p2), %s569_s22, 3 }
   0xb   : > { %v642_v0 = vld [vmem:[%s801_s1 + $0x38] sm:$0xff]   ;;  %v673_v1 = vmov 0   ;;  %v643_v2 = vld [vmem:[%s801_s1 + $0x30] sm:$0xff]   ;;  %s807_s22 = smov (!%p219_p3, %s569_s22), 3  ;;  %v644_v3 = vld [vmem:[%s801_s1 + $0x28] sm:$0xff]   ;;  %v674_v4 = vmov 0.0  }
   0xc   : > { %350 = vmatprep.subr.bf16.mxu0 %v673_v1  ;;  %611 = vmatprep.subr.bf16.mxu1 %v674_v4  ;;  %s601_s27 = sshll.u32 %s807_s22, 3  ;;  %v645_v5 = vld [vmem:[%s801_s1 + $0x20] sm:$0xff]   ;;  %v646_v6 = vld [vmem:[%s801_s1 + $0x18] sm:$0xff]   ;;  %vm346_vm0 = vcmask 523264   ;;  %v658_v9 = vld [vmem:[%s803_s3 + $0x30] sm:$0xff]   ;;  %vm675_vm1 = vmmov 0  }
   0xd   : > { %351 = vmatpush1.bf16.msra.mxu0 %v642_v0  ;;  %s734_s7 = scalar_lea.vmem %s800_s0, %s601_s27  ;;  %v657_v8 = vld [vmem:[%s803_s3 + $0x38] sm:$0xff]   ;;  %v647_v10 = vld [vmem:[%s801_s1 + $0x10] sm:$0xff]   ;;  %v659_v11 = vld [vmem:[%s803_s3 + $0x28] sm:$0xff]   ;;  %627 = vmatprep.mubr.msk.bf16.mxu1 %vm675_vm1, %v674_v4  ;;  %s229_s26 = scalar_lea.vmem %s805_s5, %s601_s27 }
   0xe   : > { %352 = vmatprep.subr.bf16.mxu0 %v673_v1  ;;  %v656_v7 = vld [vmem:[%s734_s7 + $0x4] ss:$8 sps:$4 sm:$0xff]   ;;  %612 = vmatpush3.bf16.msra.mxu1 %v657_v8  ;;  %v661_v15 = vld [vmem:[%s803_s3 + $0x18] sm:$0xff]   ;;  %v651_v17 = vld [vmem:[%s801_s1 + $0x50] sm:$0xff]  }
   0xf   : > { %589 = vmatprep.mubr.msk.bf16.mxu0 %vm346_vm0, %v656_v7  ;;  %613 = vmatprep.subr.bf16.mxu1 %v674_v4  ;;  %v648_v12 = vld [vmem:[%s801_s1 + $0x8] sm:$0xff]   ;;  %v660_v13 = vld [vmem:[%s803_s3 + $0x20] sm:$0xff]   ;;  %v650_v16 = vld [vmem:[%s801_s1 + $0x58] sm:$0xff]  }
  0x10   : > { %v649_v14 = vld [vmem:[%s801_s1] sm:$0xff]   ;;  %v652_v18 = vld [vmem:[%s801_s1 + $0x48] sm:$0xff]   ;;  %v662_v21 = vld [vmem:[%s803_s3 + $0x10] sm:$0xff]  }
  0x11   : > { %353 = vmatpush1.bf16.msra.mxu0 %v643_v2  ;;  %v653_v19 = vld [vmem:[%s801_s1 + $0x40] sm:$0xff]   ;;  %v663_v22 = vld [vmem:[%s803_s3 + $0x8] sm:$0xff]  }
  0x12   : > { %354 = vmatprep.subr.bf16.mxu0 %v673_v1  ;;  %614 = vmatpush3.bf16.msra.mxu1 %v658_v9  ;;  %v654_v20 = vld [vmem:[%s734_s7] ss:$8 sps:$4 sm:$0xff]  }
  0x13   : > { %615 = vmatprep.subr.bf16.mxu1 %v674_v4  ;;  %v664_v23 = vld [vmem:[%s803_s3] sm:$0xff]  }
  0x14   : > { %v574_v24 = vld [vmem:[%s802_s2] ss:$0 sm:$0xff] }
  0x15   : > { %355 = vmatpush1.bf16.msra.mxu0 %v644_v3  ;;  %v590_v34 = vld [vmem:[%s804_s4] ss:$0 sm:$0xff] }
  0x16   : > { %356 = vmatprep.subr.bf16.mxu0 %v673_v1  ;;  %616 = vmatpush3.bf16.msra.mxu1 %v659_v11 }
  0x17   : > { %617 = vmatprep.subr.bf16.mxu1 %v674_v4 }
  0x19   : > { %357 = vmatpush1.bf16.msra.mxu0 %v645_v5 }
  0x1a   : > { %358 = vmatprep.subr.bf16.mxu0 %v673_v1  ;;  %618 = vmatpush3.bf16.msra.mxu1 %v660_v13 }
  0x1b   : > { %619 = vmatprep.subr.bf16.mxu1 %v674_v4 }
  0x1d   : > { %359 = vmatpush1.bf16.msra.mxu0 %v646_v6 }
  0x1e   : > { %360 = vmatprep.subr.bf16.mxu0 %v673_v1  ;;  %620 = vmatpush3.bf16.msra.mxu1 %v661_v15 }
  0x1f   : > { %621 = vmatprep.subr.bf16.mxu1 %v674_v4 }
  0x21   : > { %361 = vmatpush1.bf16.msra.mxu0 %v647_v10 }
  0x22   : > { %362 = vmatprep.subr.bf16.mxu0 %v673_v1  ;;  %622 = vmatpush3.bf16.msra.mxu1 %v662_v21 }
  0x23   : > { %623 = vmatprep.subr.bf16.mxu1 %v674_v4 }
  0x25   : > { %363 = vmatpush1.bf16.msra.mxu0 %v648_v12 }
  0x26   : > { %364 = vmatprep.subr.bf16.mxu0 %v673_v1  ;;  %624 = vmatpush3.bf16.msra.mxu1 %v663_v22 }
  0x27   : > { %625 = vmatprep.subr.bf16.mxu1 %v674_v4 }
  0x29   : > { %365 = vmatpush1.bf16.msra.mxu0 %v649_v14 }
  0x2a   : > { %374 = vmatprep.subr.bf16.mxu0 %v673_v1  ;;  %626 = vmatpush3.bf16.msra.mxu1 %v664_v23 }
  0x2d   : > { %375 = vmatpush2.bf16.msra.mxu0 %v650_v16 }
  0x2e   : > { %376 = vmatprep.subr.bf16.mxu0 %v673_v1 }
  0x31   : > { %377 = vmatpush2.bf16.msra.mxu0 %v651_v17 }
  0x32   : > { %378 = vmatprep.subr.bf16.mxu0 %v673_v1 }
  0x35   : > { %379 = vmatpush2.bf16.msra.mxu0 %v652_v18 }
  0x36   : > { %380 = vmatprep.subr.bf16.mxu0 %v673_v1 }
  0x39   : > { %381 = vmatpush2.bf16.msra.mxu0 %v653_v19 }
  0x3c   : > { %383 = vmatmul.mubr.bf16.vlgmr.msra.gmra.mxu0 %v654_v20 }
  0xfc   : > { %v384_v25 = vpop.f32.mrf.mxu0 }
  0xfd   : > { %v385_v27 = vadd.f32 %v574_v24, %v384_v25 }
  0xfe   : > { %v386_v26 = vpop.f32.mrf.mxu0 }
  0xff   : > { %v391_v31 = vmax.f32 %v385_v27, 0.0 }
 0x100   : > { %v387_v28 = vpop.f32.mrf.mxu0 }
 0x101   : > { %v388_v29 = vadd.f32 %v574_v24, %v387_v28 }
 0x102   : > { %v389_v30 = vpop.f32.mrf.mxu0 }
 0x103   : > { %v392_v32 = vmax.f32 %v388_v29, 0.0 }
 0x105   : > { %v393_v33 = vpack.c.bf16 %v392_v32, %v391_v31 }
 0x107   : > { %628 = vmatmul.mubr.bf16.vlgmr.msra.gmra.mxu1 %v393_v33 }
 0x1c7   : > { %v499_v35 = vpop.f32.mrf.mxu1 }
 0x1c8   : > { %v500_v36 = vadd.f32 %v590_v34, %v499_v35 }
 0x1c9   : > { %v629_v37 = vpop.f32.mrf.mxu1 }
 0x1ca   : > { %506 = vst [vmem:[%s229_s26] sm:$0xff] %v500_v36 }
 0x1cb   : > { %v502_v38 = vpop.f32.mrf.mxu1 }
 0x1cc   : > { %v503_v39 = vadd.f32 %v590_v34, %v502_v38 }
 0x1cd   : > { %v630_v40 = vpop.f32.mrf.mxu1 }
 0x1ce   : > { %507 = vst [vmem:[%s229_s26 + $0x8] sm:$0xff] %v503_v39 }
 0x1cf PF: > { %s15_s18 = sadd.s32 1, %s671_s18  }
 0x1d0   : > { %p12_p4 = scmp.ge.s32.totalorder %s15_s18, 4  }
 0x1d2   :  { %14 = sbr.rel (!%p12_p4) target bundleno = 1 (0x1), region = 70 }

// kernel: drnseg_forward.3
= control target key start
LH: loop header
LB: loop body
LE: loop exit
PB: predicated region body
PF: predicated region fallthrough
CT: control target
= control target key end

     0   :  { %8 = vsyncpa [#allocation3], 0  ;;  %s961_s0 = inlined_call_operand.vmem [shape: f32[8,4,4], index: 0, kind: input, shape index: {}]   ;;  %s962_s1 = inlined_call_operand.vmem [shape: bf16[32,4], index: 1, kind: input, shape index: {}]   ;;  %s963_s2 = inlined_call_operand.vmem [shape: bf16[4,32], index: 2, kind: input, shape index: {}]   ;;  %s964_s3 = inlined_call_operand.hbm [shape: f32[8,32,32], index: 3, kind: output, shape index: {}]  }
   0x1   :  { %10 = vsyncpa [#allocation3 + $0x1], 0  ;;  %s794_s12 = smov 0   ;;  %s796_s13 = smov 0  }
   0x2   :  { %s798_s14 = smov 0   ;;  %s800_s15 = smov 0  }
   0x3 LB: > { %s815_s16 = sadd.s32 4294967295, %s766_s15   ;;  %s584_s17 = sadd.s32 4294967294, %s766_s15   ;;  %s766_s15 = sphi %s800_s15, %s970_s15   ;;  %s762_s14 = sphi %s798_s14, %s969_s14   ;;  %s758_s13 = sphi %s796_s13, %s968_s13   ;;  %s754_s12 = sphi %s794_s12, %s967_s12  }
   0x4   : > { %s819_s18 = sadd.s32 1, %s766_s15   ;;  %s91_s19 = sadd.s32 1, %s762_s14 }
   0x5   : > { %s88_s20 = ssub.s32 %s766_s15, %s819_s18  ;;  %p101_p0 = scmp.ne.s32.totalorder %s762_s14, %s758_s13 }
   0x6   : > { %p89_p1 = scmp.eq.s32.totalorder %s88_s20, 0  ;;  %p102_p2 = scmp.eq.s32.totalorder %s815_s16, 1 }
   0x7   : > { %p107_p3 = scmp.ne.s32.totalorder %s758_s13, %s754_s12  ;;  %p108_p4 = scmp.eq.s32.totalorder %s584_s17, 1 }
   0x8   : > { %s830_s21 = scalar_select %p89_p1, %s762_s14, %s91_s19  }
   0x9   : > { %p832_p5 = por %p102_p2, %p101_p0  ;;  %p836_p6 = por %p108_p4, %p107_p3 }
   0xa   : > { %p587_p7 = scmp.ge.s32.totalorder %s766_s15, 1  ;;  %p141_p8 = scmp.lt.s32.totalorder %s766_s15, 3 }
   0xc   : > { %p142_p9 = pnand %p587_p7, %p141_p8 }
   0xd   : > { %s589_s26 = sshll.u32 (!%p142_p9), %s815_s16, 2  ;;  %s162_s8 = sand.u32 (!%p142_p9), 1, %s758_s13  }
   0xe   : > { %145 = sbr.rel (%p142_p9) target bundleno = 453 (0x1c5), region = 32  ;;  %p166_p10 = scmp.lt.s32.totalorder (!%p142_p9), %s589_s26, 7 }
   0xf   : > { %s588_s9 = sshll.u32 (!%p142_p9), %s162_s8, 7  ;;  %s611_s11 = sshll.u32 (!%p142_p9), %s815_s16, 11 }
  0x10   : > { %s876_s10 = scalar_lea.vmem (!%p142_p9), [#allocation2], %s588_s9  ;;  %s909_s24 = scalar_lea.hbm (!%p142_p9), %s964_s3, %s611_s11 }
  0x11   : > { %s522_s17 = sshll.u32 (!%p142_p9), %s876_s10, 4  ;;  %s921_s16 = scalar_lea.sflag (!%p142_p9), [#allocation3], %s162_s8  ;;  %s911_s17 = int_to_ptr.vmem [resolvable:$true] %s522_s17 }
  0x12   : > { %s706_s25 = scalar_lea.vmem (!%p142_p9), %s911_s17, 2048 }
  0x13   : > { %v181_v0 = vld [vmem:[%s963_s2] sm:$0x3]  ;;  %vm207_vm0 = vcmask 1041408   ;;  %v191_v1 = vlaneseq  ;;  %v768_v2 = vmov 0.0   ;;  %vm769_vm1 = vmmov 0   ;;  %s972_s26 = smov (!%p166_p10, %s589_s26), 7  ;;  %p707_p11 = scmp.ne.s32.totalorder %s911_s17, %s706_s25 }
  0x14   : > { %626 = vmatprep.subr.bf16.mxu0 %v768_v2  ;;  %v209_v3 = vsel %vm207_vm0, %v181_v0, 0  ;;  %628 = vmatprep.mubr.msk.bf16.mxu0 %vm769_vm1, %v768_v2  ;;  %v770_v4 = vmov 1983009808   ;;  %s590_s27 = sshll.u32 %s972_s26, 2  ;;  %vm203_vm2 = vcmask 31744   ;;  %v704_v18 = vld [vmem:[%s962_s1] sm:$0xff]  }
  0x15   : > { %627 = vmatpush3.bf16.msra.mxu0 %v209_v3  ;;  %v189_v5 = vunpack.c.l.s4 %v770_v4  ;;  %v192_v6 = vshrl.u32 %v191_v1, 7  ;;  %s169_s30 = scalar_lea.vmem %s961_s0, %s590_s27  ;;  %634 = vmatprep.mubr.msk.bf16.mxu1 %vm203_vm2, %v704_v18  ;;  %v705_v25 = vld [vmem:[%s962_s1 + $0x8] sm:$0xff]   ;;  %vm490_vm3 = vcmask 261120   ;;  %p708_p12 = pnand %p707_p11, %p832_p5 }
  0x16   : > { %v173_v9 = vld [vmem:[%s169_s30] sm:$0xf]  ;;  %v174_v10 = vld [vmem:[%s169_s30 + $0x4] sm:$0xf]  ;;  %v175_v11 = vld [vmem:[%s169_s30 + $0x8] sm:$0xf] }
  0x17   : > { %v190_v7 = vunpack.c.0.s8 %v189_v5  ;;  %v176_v12 = vld [vmem:[%s169_s30 + $0xc] sm:$0xf]  ;;  %v591_v13 = vpack.c.bf16 %v174_v10, %v173_v9  ;;  %p709_p13 = pneg %p708_p12  ;;  %s771_s26 = smov [#allocation2]  }
  0x18   : > { %v592_v14 = vpack.c.bf16 %v176_v12, %v175_v11  ;;  %s710_s27 = sshll.u32 %s771_s26, 4  ;;  %s711_s27 = int_to_ptr.vmem [resolvable:$false] %s710_s27 }
  0x19   : > { %v193_v8 = vsub.s32 %v190_v7, %v192_v6  ;;  %s712_s28 = scalar_lea.vmem %s711_s27, 4096  ;;  %p713_p0 = scmp.lt.s32.totalorder %s911_s17, %s711_s27 }
  0x1a   : > { %p714_p1 = scmp.lt.s32.totalorder %s712_s28, %s706_s25 }
  0x1b   : > { %v194_v15 = vrot.slane %v591_v13, %v193_v8  ;;  %v201_v16 = vrot.slane %v592_v14, %v193_v8 }
  0x1c   : > { %p715_p2 = por %p714_p1, %p713_p0 }
  0x1d   : > { %v202_v17 = vcombine.low %v194_v15, %v201_v16 }
  0x1e   : > { %p716_p3 = pnand %p715_p2, %p709_p13 }
  0x1f   : > { %629 = vmatmul.mubr.msk.bf16.vlgmr.msra.gmra.mxu0 %vm203_vm2, %v202_v17 }
  0x20   : > { %640 = vmatprep.mubr.msk.bf16.mxu0 %vm203_vm2, %v704_v18 }
  0xdf   : > { %v245_v19 = vpop.f32.mrf.mxu0 }
  0xe0   : > { %v254_v20 = vcombine.high %v245_v19, %v245_v19  ;;  %v258_v21 = vpack.c.bf16 %v245_v19, %v245_v19 }
  0xe1   : > { %v630_v22 = vpop.f32.mrf.mxu0 }
  0xe2   : > { %v259_v23 = vpack.c.bf16 %v254_v20, %v254_v20  ;;  %656 = vmatprep.subr.msk.bf16.mxu1 %vm207_vm0, %v258_v21  ;;  %v283_v24 = vsel %vm207_vm0, %v258_v21, 0 }
  0xe3   : > { %v248_v26 = vpop.f32.mrf.mxu0  ;;  %633 = vmatpush3.bf16.msra.mxu1 %v283_v24 }
  0xe4   : > { %v255_v27 = vcombine.high %v248_v26, %v248_v26  ;;  %v260_v28 = vpack.c.bf16 %v248_v26, %v248_v26  ;;  %657 = vmatprep.subr.msk.bf16.mxu0 %vm207_vm0, %v259_v23  ;;  %v335_v29 = vsel %vm207_vm0, %v259_v23, 0 }
  0xe5   : > { %v631_v30 = vpop.f32.mrf.mxu0  ;;  %639 = vmatpush3.bf16.msra.mxu0 %v335_v29 }
  0xe6   : > { %v261_v31 = vpack.c.bf16 %v255_v27, %v255_v27  ;;  %658 = vmatprep.subr.msk.bf16.mxu1 %vm207_vm0, %v260_v28  ;;  %635 = vmatmul.mubr.msk.bf16.vlgmr.msra.gmra.mxu1 %vm203_vm2, %v705_v25  ;;  %v387_v32 = vsel %vm207_vm0, %v260_v28, 0 }
  0xe7   : > { %645 = vmatpush3.bf16.msra.mxu1 %v387_v32  ;;  %646 = vmatprep.mubr.msk.bf16.mxu1 %vm203_vm2, %v704_v18 }
  0xe8   : > { %641 = vmatmul.mubr.msk.bf16.vlgmr.msra.gmra.mxu0 %vm203_vm2, %v705_v25  ;;  %659 = vmatprep.subr.msk.bf16.mxu0 %vm207_vm0, %v261_v31  ;;  %v439_v33 = vsel %vm207_vm0, %v261_v31, 0 }
  0xe9   : > { %651 = vmatpush3.bf16.msra.mxu0 %v439_v33  ;;  %652 = vmatprep.mubr.msk.bf16.mxu0 %vm203_vm2, %v704_v18 }
  0xee   : > { %647 = vmatmul.mubr.msk.bf16.vlgmr.msra.gmra.mxu1 %vm203_vm2, %v705_v25 }
  0xf0   : > { %653 = vmatmul.mubr.msk.bf16.vlgmr.msra.gmra.mxu0 %vm203_vm2, %v705_v25 }
 0x1a6   : > { %v636_v34 = vpop.f32.mrf.mxu1 }
 0x1a7   : > { %493 = vst.msk [vmem:[%s876_s10 + $0x10] sm:$0xff] %vm490_vm3, %v636_v34 }
 0x1a8   : > { %v642_v35 = vpop.f32.mrf.mxu0  ;;  %v319_v36 = vpop.f32.mrf.mxu1 }
 0x1a9   : > { %497 = vst.msk [vmem:[%s876_s10 + $0x30] sm:$0xff] %vm490_vm3, %v642_v35  ;;  %491 = vst.msk [vmem:[%s876_s10] sm:$0xff] %vm490_vm3, %v319_v36 }
 0x1aa   : > { %v371_v37 = vpop.f32.mrf.mxu0  ;;  %v637_v38 = vpop.f32.mrf.mxu1 }
 0x1ab   : > { %495 = vst.msk [vmem:[%s876_s10 + $0x20] sm:$0xff] %vm490_vm3, %v371_v37  ;;  %494 = vst.msk [vmem:[%s876_s10 + $0x18] sm:$0xff] %vm490_vm3, %v637_v38 }
 0x1ac   : > { %v643_v39 = vpop.f32.mrf.mxu0  ;;  %v322_v40 = vpop.f32.mrf.mxu1 }
 0x1ad   : > { %498 = vst.msk [vmem:[%s876_s10 + $0x38] sm:$0xff] %vm490_vm3, %v643_v39  ;;  %492 = vst.msk [vmem:[%s876_s10 + $0x8] sm:$0xff] %vm490_vm3, %v322_v40 }
 0x1ae   : > { %v374_v41 = vpop.f32.mrf.mxu0  ;;  %v648_v42 = vpop.f32.mrf.mxu1 }
 0x1af   : > { %496 = vst.msk [vmem:[%s876_s10 + $0x28] sm:$0xff] %vm490_vm3, %v374_v41  ;;  %501 = vst.msk [vmem:[%s876_s10 + $0x50] sm:$0xff] %vm490_vm3, %v648_v42 }
 0x1b0   : > { %v654_v43 = vpop.f32.mrf.mxu0  ;;  %v423_v44 = vpop.f32.mrf.mxu1 }
 0x1b1   : > { %505 = vst.msk [vmem:[%s876_s10 + $0x70] sm:$0xff] %vm490_vm3, %v654_v43  ;;  %499 = vst.msk [vmem:[%s876_s10 + $0x40] sm:$0xff] %vm490_vm3, %v423_v44 }
 0x1b2   : > { %v475_v45 = vpop.f32.mrf.mxu0  ;;  %v649_v46 = vpop.f32.mrf.mxu1 }
 0x1b3   : > { %503 = vst.msk [vmem:[%s876_s10 + $0x60] sm:$0xff] %vm490_vm3, %v475_v45  ;;  %502 = vst.msk [vmem:[%s876_s10 + $0x58] sm:$0xff] %vm490_vm3, %v649_v46 }
 0x1b4   : > { %v655_v47 = vpop.f32.mrf.mxu0  ;;  %v426_v48 = vpop.f32.mrf.mxu1 }
 0x1b5   : > { %506 = vst.msk [vmem:[%s876_s10 + $0x78] sm:$0xff] %vm490_vm3, %v655_v47  ;;  %500 = vst.msk [vmem:[%s876_s10 + $0x48] sm:$0xff] %vm490_vm3, %v426_v48 }
 0x1b6   : > { %v478_v49 = vpop.f32.mrf.mxu0 }
 0x1b7   : > { %504 = vst.msk [vmem:[%s876_s10 + $0x68] sm:$0xff] %vm490_vm3, %v478_v49 }
 0x1b8   : > { %719 = shalt.err (!%p716_p3)
}
 0x1b9   : > { %s720_s29 = scalar_lea.hbm %s909_s24, 2048  ;;  %s724_s5 = scalar_lea.hbm %s964_s3, 4096 }
 0x1ba   : > { %p721_p4 = scmp.ne.s32.totalorder %s909_s24, %s720_s29  ;;  %p725_p9 = scmp.lt.s32.totalorder %s909_s24, %s964_s3 }
 0x1bb   : > { %p726_p10 = scmp.lt.s32.totalorder %s724_s5, %s720_s29 }
 0x1bc   : > { %p722_p7 = pnand %p721_p4, %p832_p5 }
 0x1bd   : > { %p727_p11 = por %p726_p10, %p725_p9 }
 0x1be   : > { %p723_p8 = pneg %p722_p7 }
 0x1c0   : > { %p728_p12 = pnand %p727_p11, %p723_p8 }
 0x1c2   : > { %731 = shalt.err (!%p728_p12)
}
 0x1c3   : > { %s772_s8 = smov 128   ;;  %s773_s9 = smov 8  }
 0x1c4   : > { %660 = dma.vmem_to_hbm [thread:$0]  (%p832_p5), %s911_s17, 2048, %s909_s24, %s921_s16, %s772_s8, %s772_s8, %s773_s9  }
 0x1c5 PF: > { %p666_p13 = scmp.ge.s32.totalorder %s766_s15, 2  ;;  %s537_s10 = sand.u32 1, %s754_s12  }
 0x1c6   : > { %s538_s11 = scalar_lea.sflag [#allocation3], %s537_s10 }
 0x1c7   : > { %p663_p0 = pnand %p666_p13, %p836_p6 }
 0x1c9   : > { %p664_p1 = pneg %p663_p0 }
 0x1cb   : > { %749 = dma.done.wait (%p664_p1), %s538_s11, 2048  }
 0x1cc   : > { %751 = vsyncadd (%p664_p1), %s538_s11, 4294965248  ;;  %p13_p2 = scmp.ge.s32.totalorder %s819_s18, 4   ;;  %s967_s12 = smov %s758_s13 }
 0x1cd   : > { %s968_s13 = smov %s762_s14  ;;  %s969_s14 = smov %s830_s21 }
 0x1ce   : > { %s970_s15 = smov %s819_s18  ;;  %15 = sbr.rel (!%p13_p2) target bundleno = 3 (0x3), region = 67 }
 0x1d3   :  { %543 = vsyncpa [#allocation3], 1 }
 0x1d4   :  { %545 = vsyncpa [#allocation3 + $0x1], 1 }

</bundles_post_ra>
